<compile_context>
chip_gen: v7x
topology: tpu7x:2x2x1
jax: 0.10.0
libtpu: 0.0.40
codegen_flags: <defaults>
</compile_context>

<pallas_src>
import jax
import jax.numpy as jnp
from jax.experimental import pallas as pl
from jax.experimental.pallas import tpu as pltpu

# ----------------------------------------------------------------------------
# Constants / small helpers
# ----------------------------------------------------------------------------

BN_EPS = 1e-5
STAGE_BLOCKS = [3, 4, 14, 3]          # IR-50 block counts
IN_WIDTH = 8                          # reduced from 64
STAGE_WIDTHS = [8, 16, 32, 64]        # reduced from [64, 128, 256, 512]
EMB_DIM = 64                          # reduced from 512
ACT_DTYPE = jnp.bfloat16
CIN_PAD = 8                           # pad the RGB stem to 8 input channels


def _ru(v, m):
    return ((v + m - 1) // m) * m


def slab_geom(H, W):
    """Padded-frame geometry: Hp, Wp, L (=Hp*Wp), guard G (128-aligned), S."""
    Hp, Wp = H + 2, W + 2
    L = Hp * Wp
    G = _ru(Wp + 1, 128)
    return Hp, Wp, L, G, L + 2 * G


def to_slab(x_nchw, dtype=ACT_DTYPE):
    """(N,C,H,W) -> (N,C,S) slab with zero border ring + zero guard columns."""
    N, C, H, W = x_nchw.shape
    Hp, Wp, L, G, S = slab_geom(H, W)
    xp = jnp.pad(x_nchw, ((0, 0), (0, 0), (1, 1), (1, 1)))
    flat = xp.reshape(N, C, L)
    return jnp.pad(flat, ((0, 0), (0, 0), (G, G))).astype(dtype)


def from_slab(slab, H, W, dtype=None):
    """(N,C,S) slab -> (N,C,H,W)."""
    N, C, S = slab.shape
    Hp, Wp, L, G, S2 = slab_geom(H, W)
    assert S == S2
    x = slab[:, :, G:G + L].reshape(N, C, Hp, Wp)[:, :, 1:H + 1, 1:W + 1]
    return x if dtype is None else x.astype(dtype)


def make_indicator(H, W):
    """(1, S) f32 indicator of real (non-border, non-guard) pixels."""
    Hp, Wp, L, G, S = slab_geom(H, W)
    ind = jnp.zeros((Hp, Wp), jnp.float32).at[1:H + 1, 1:W + 1].set(1.0)
    return jnp.pad(ind.reshape(1, L), ((0, 0), (G, G)))


# ----------------------------------------------------------------------------
# Fused conv kernel on slab-layout activations
# ----------------------------------------------------------------------------

def conv_slab(x_slab, w_taps, ind, H, W, *, in_bias=None, out_scale=None,
              out_bias=None, prelu_slope=None, residual=None,
              out_dtype=ACT_DTYPE):
    """Stride-1 3x3 (T=9) or 1x1 (T=1) conv, fully fused:

        y = prelu( (sum_t W_t @ x[:, .+off_t] + bias_terms) * out_scale + out_bias )
        y = y * indicator   (+ residual)

    x_slab   : (N, Cin, S)  bf16 slab (zero border + guards)
    w_taps   : (T, Cout, Cin) weights, pre-conv BN *scale* already folded
    ind      : (1, S) f32 real-pixel indicator for this resolution
    in_bias  : (T, Cout, 1) f32 folded pre-conv BN bias (exact at borders)
    out_scale/out_bias : (Cout,) post-conv BN; prelu_slope : (Cout,)
    residual : (N, Cout, S) slab added in the epilogue (identity shortcut)
    """
    N, Cin, S = x_slab.shape
    T, Cout, Cin2 = w_taps.shape
    Hp, Wp, L, G, S2 = slab_geom(H, W)
    assert S == S2 and Cin2 == Cin
    if T == 9:
        offs = tuple((di - 1) * Wp + (dj - 1) for di in range(3) for dj in range(3))
    elif T == 1:
        offs = (0,)
    else:
        raise ValueError("only 3x3 or 1x1 convs supported")

    has_ib = in_bias is not None
    has_oa = out_scale is not None
    has_pr = prelu_slope is not None
    has_res = residual is not None

    def kernel(*refs):
        it = iter(refs)
        x_ref = next(it)
        w_ref = next(it)
        ind_ref = next(it)
        ib_ref = next(it) if has_ib else None
        osc_ref = next(it) if has_oa else None
        obi_ref = next(it) if has_oa else None
        sl_ref = next(it) if has_pr else None
        res_ref = next(it) if has_res else None
        o_ref = next(it)

        acc = None
        for t in range(T):
            a = G + offs[t]
            xs = x_ref[0, :, a:a + L]                         # (Cin, L) bf16
            part = jnp.dot(w_ref[t], xs, preferred_element_type=jnp.float32)
            acc = part if acc is None else acc + part         # (Cout, L) f32
        if has_ib:
            # exact pre-conv BN bias: per-tap rank-1 update gated by indicator
            for t in range(T):
                a = G + offs[t]
                acc = acc + ib_ref[t] * ind_ref[:, a:a + L]
        y = acc
        if has_oa:
            y = y * osc_ref[...] + obi_ref[...]
        if has_pr:
            sl = sl_ref[...]
            y = jnp.where(y >= 0.0, y, y * sl)
        y = y * ind_ref[:, G:G + L]                           # zero border ring
        if has_res:
            y = y + res_ref[0, :, G:G + L].astype(jnp.float32)
        o_ref[0, :, G:G + L] = y.astype(o_ref.dtype)
        zg = jnp.zeros((Cout, G), o_ref.dtype)
        o_ref[0, :, 0:G] = zg                                 # keep guard columns zero
        o_ref[0, :, S - G:S] = zg

    in_specs = [
        pl.BlockSpec((1, Cin, S), lambda n: (n, 0, 0)),
        pl.BlockSpec((T, Cout, Cin), lambda n: (0, 0, 0)),
        pl.BlockSpec((1, S), lambda n: (0, 0)),
    ]
    args = [x_slab, w_taps.astype(jnp.bfloat16), ind]
    if has_ib:
        in_specs.append(pl.BlockSpec((T, Cout, 1), lambda n: (0, 0, 0)))
        args.append(in_bias.astype(jnp.float32))
    if has_oa:
        in_specs.append(pl.BlockSpec((Cout, 1), lambda n: (0, 0)))
        args.append(out_scale.reshape(Cout, 1).astype(jnp.float32))
        in_specs.append(pl.BlockSpec((Cout, 1), lambda n: (0, 0)))
        args.append(out_bias.reshape(Cout, 1).astype(jnp.float32))
    if has_pr:
        in_specs.append(pl.BlockSpec((Cout, 1), lambda n: (0, 0)))
        args.append(prelu_slope.reshape(Cout, 1).astype(jnp.float32))
    if has_res:
        in_specs.append(pl.BlockSpec((1, Cout, S), lambda n: (n, 0, 0)))
        args.append(residual)

    return pl.pallas_call(
        kernel,
        out_shape=jax.ShapeDtypeStruct((N, Cout, S), out_dtype),
        grid=(N,),
        in_specs=in_specs,
        out_specs=pl.BlockSpec((1, Cout, S), lambda n: (n, 0, 0)),
        compiler_params=pltpu.CompilerParams(dimension_semantics=("parallel",)),
    )(*args)


# ----------------------------------------------------------------------------
# Bilinear 112x112 resize kernel (align_corners=True, separable)
# ----------------------------------------------------------------------------

def bilinear_matrix(out_size, in_size):
    if in_size == 1:
        return jnp.ones((out_size, 1), jnp.float32)
    src = jnp.arange(out_size, dtype=jnp.float32) * (in_size - 1) / (out_size - 1)
    lo = jnp.floor(src).astype(jnp.int32)
    hi = jnp.minimum(lo + 1, in_size - 1)
    w_hi = src - lo.astype(jnp.float32)
    w_lo = 1.0 - w_hi
    M = jnp.zeros((out_size, in_size), jnp.float32)
    rows = jnp.arange(out_size)
    M = M.at[rows, lo].add(w_lo)
    M = M.at[rows, hi].add(w_hi)
    return M


def _resize_kernel(x_ref, mh_ref, mwt_ref, o_ref):
    t = jnp.dot(mh_ref[...], x_ref[0], preferred_element_type=jnp.float32)
    o_ref[0] = jnp.dot(t, mwt_ref[...], preferred_element_type=jnp.float32)


def bilinear_resize_112(x):
    N, C, H, W = x.shape
    Mh = bilinear_matrix(112, H)
    MwT = bilinear_matrix(112, W).T
    xf = x.reshape(N * C, H, W).astype(jnp.float32)
    out = pl.pallas_call(
        _resize_kernel,
        out_shape=jax.ShapeDtypeStruct((N * C, 112, 112), jnp.float32),
        grid=(N * C,),
        in_specs=[pl.BlockSpec((1, H, W), lambda i: (i, 0, 0)),
                  pl.BlockSpec((112, H), lambda i: (0, 0)),
                  pl.BlockSpec((W, 112), lambda i: (0, 0))],
        out_specs=pl.BlockSpec((1, 112, 112), lambda i: (i, 0, 0)),
        compiler_params=pltpu.CompilerParams(dimension_semantics=("parallel",)),
    )(xf, Mh, MwT)
    return out.reshape(N, C, 112, 112)


def center_crop_tensor(x, size):
    H, W = x.shape[-2], x.shape[-1]
    top, left = (H - size) // 2, (W - size) // 2
    return x[..., top:top + size, left:left + size]


# ----------------------------------------------------------------------------
# Output head kernel: Linear (BN2d / BN1d pre-folded) + l2-norm with eps
# ----------------------------------------------------------------------------

def _head_kernel(a_ref, b_ref, bias_ref, o_ref):
    y = jnp.dot(a_ref[...], b_ref[...], preferred_element_type=jnp.float32)
    y = y + bias_ref[...]
    inv = jax.lax.rsqrt(jnp.sum(y * y, axis=1, keepdims=True) + 1e-12)
    o_ref[...] = y * inv


# ----------------------------------------------------------------------------
# Parameters (synthetic, deterministic)
# ----------------------------------------------------------------------------

class KeyGen:
    def __init__(self, seed):
        self._key = jax.random.PRNGKey(seed)

    def __call__(self):
        self._key, sub = jax.random.split(self._key)
        return sub


def make_conv(kg, cin, cout, k):
    fan = cin * k * k
    return jax.random.normal(kg(), (cout, cin, k, k), jnp.float32) * (2.0 / fan) ** 0.5


def make_bn(kg, c):
    return dict(
        gamma=jax.random.uniform(kg(), (c,), jnp.float32, 0.5, 1.5),
        beta=0.1 * jax.random.normal(kg(), (c,), jnp.float32),
        mean=0.1 * jax.random.normal(kg(), (c,), jnp.float32),
        var=jax.random.uniform(kg(), (c,), jnp.float32, 0.5, 1.5),
    )


def bn_scale_bias(bn):
    s = bn["gamma"] / jnp.sqrt(bn["var"] + BN_EPS)
    b = bn["beta"] - bn["mean"] * s
    return s, b


def conv_w_to_taps(w):
    """(Cout, Cin, kh, kw) -> (kh*kw, Cout, Cin), tap index = di*kw + dj."""
    Cout, Cin, kh, kw = w.shape
    return w.transpose(2, 3, 0, 1).reshape(kh * kw, Cout, Cin)


def make_bottleneck(kg, cin, cout, stride):
    p = dict(cin=cin, cout=cout, stride=stride)
    if cin != cout:
        p["sc_conv"] = make_conv(kg, cin, cout, 1)
        p["sc_bn"] = make_bn(kg, cout)
    p["bn1"] = make_bn(kg, cin)
    p["conv1"] = make_conv(kg, cin, cout, 3)
    p["prelu"] = jnp.full((cout,), 0.25, jnp.float32)
    p["conv2"] = make_conv(kg, cout, cout, 3)
    p["bn2"] = make_bn(kg, cout)
    return p


def build_params(kg):
    params = {}
    params["input_conv"] = make_conv(kg, 3, IN_WIDTH, 3)
    params["input_bn"] = make_bn(kg, IN_WIDTH)
    params["input_prelu"] = jnp.full((IN_WIDTH,), 0.25, jnp.float32)
    body = []
    in_c = IN_WIDTH
    for depth, num in zip(STAGE_WIDTHS, STAGE_BLOCKS):
        for u in range(num):
            stride = 2 if u == 0 else 1
            body.append(make_bottleneck(kg, in_c, depth, stride))
            in_c = depth
    params["body"] = body
    params["out_bn2d"] = make_bn(kg, STAGE_WIDTHS[-1])
    params["linear_w"] = (jax.random.normal(kg(), (EMB_DIM, STAGE_WIDTHS[-1] * 7 * 7),
                                            jnp.float32)
                          * (1.0 / (STAGE_WIDTHS[-1] * 7 * 7)) ** 0.5)
    params["linear_b"] = 0.01 * jax.random.normal(kg(), (EMB_DIM,), jnp.float32)
    params["out_bn1d"] = make_bn(kg, EMB_DIM)
    return params


# ----------------------------------------------------------------------------
# Forward
# ----------------------------------------------------------------------------

def bottleneck_fwd(p, x_slab, H, W, ind_for):
    cin, cout, stride = p["cin"], p["cout"], p["stride"]
    ind = ind_for(H, W)

    # fold pre-conv BN: scale into tap weights, bias as per-tap vectors (exact)
    s1, b1 = bn_scale_bias(p["bn1"])
    w1_taps = conv_w_to_taps(p["conv1"])
    w1 = w1_taps * s1[None, None, :]
    bvec1 = jnp.einsum("toc,c->to", w1_taps, b1)[..., None]     # (9, Cout, 1)
    s2, b2 = bn_scale_bias(p["bn2"])
    w2 = conv_w_to_taps(p["conv2"])

    # kernel 1: BN1 (folded) -> conv1 -> PReLU
    h = conv_slab(x_slab, w1, ind, H, W, in_bias=bvec1, prelu_slope=p["prelu"])

    if stride == 1 and cin == cout:
        # kernel 2: conv2 -> BN2 -> + identity residual (fused epilogue)
        out = conv_slab(h, w2, ind, H, W, out_scale=s2, out_bias=b2,
                        residual=x_slab)
        return out, H, W

    # stage-first block: stride-2 and/or channel change (4 of 24 blocks)
    h = conv_slab(h, w2, ind, H, W, out_scale=s2, out_bias=b2)
    if stride != 1:
        Ho, Wo = H // 2, W // 2
        h = to_slab(from_slab(h, H, W)[:, :, ::2, ::2])          # stride-2 = subsample
        x_sc = to_slab(from_slab(x_slab, H, W)[:, :, ::2, ::2])  # MaxPool(1, stride)
    else:
        Ho, Wo = H, W
        x_sc = x_slab
    if cin == cout:
        sc = x_sc
    else:
        ssc, bsc = bn_scale_bias(p["sc_bn"])
        wsc = conv_w_to_taps(p["sc_conv"])                       # (1, Cout, Cin)
        sc = conv_slab(x_sc, wsc, ind_for(Ho, Wo), Ho, Wo,
                       out_scale=ssc, out_bias=bsc)
    return h + sc, Ho, Wo


def output_head(params, l4_slab):
    N = l4_slab.shape[0]
    C = STAGE_WIDTHS[-1]
    x = from_slab(l4_slab, 7, 7, jnp.float32)                    # (N, C, 7, 7)
    a = x.reshape(N, C * 49)                                     # NCHW flatten order

    s2d, b2d = bn_scale_bias(params["out_bn2d"])
    s1d, b1d = bn_scale_bias(params["out_bn1d"])
    Wl, bl = params["linear_w"], params["linear_b"]
    s_rep = jnp.repeat(s2d, 49)
    b_rep = jnp.repeat(b2d, 49)
    Wf = Wl * s_rep[None, :]                                     # fold BN2d scale
    bias = Wl @ b_rep + bl                                       # fold BN2d bias + linear bias
    B = (Wf * s1d[:, None]).T                                    # fold BN1d scale, (C*49, E)
    bias = bias * s1d + b1d                                      # fold BN1d bias

    return pl.pallas_call(
        _head_kernel,
        out_shape=jax.ShapeDtypeStruct((N, EMB_DIM), jnp.float32),
    )(a, B, bias.reshape(1, EMB_DIM))


def arcface_forward(params, x, config):
    x = x.astype(jnp.float32)
    if x.shape[-1] != 112:
        if config["center_crop"] is not None:
            x = center_crop_tensor(x, config["center_crop"])
        x = bilinear_resize_112(x)

    inds = {}

    def ind_for(H, W):
        if (H, W) not in inds:
            inds[(H, W)] = make_indicator(H, W)
        return inds[(H, W)]

    # input layer: Conv(3->C) + BN + PReLU fused in one kernel
    xin = jnp.pad(x, ((0, 0), (0, CIN_PAD - 3), (0, 0), (0, 0)))  # pad RGB -> 8 ch
    x_slab = to_slab(xin)
    w_in = jnp.pad(conv_w_to_taps(params["input_conv"]),
                   ((0, 0), (0, 0), (0, CIN_PAD - 3)))
    s_in, b_in = bn_scale_bias(params["input_bn"])
    H, W = 112, 112
    h = conv_slab(x_slab, w_in, ind_for(H, W), H, W,
                  out_scale=s_in, out_bias=b_in,
                  prelu_slope=params["input_prelu"])

    body = params["body"]

    def run(blocks, t, H, W):
        for blk in blocks:
            t, H, W = bottleneck_fwd(blk, t, H, W, ind_for)
        return t, H, W

    l1, H, W = run(body[:3], h, H, W)
    layer1 = from_slab(l1, H, W, jnp.float32)
    l2, H, W = run(body[3:7], l1, H, W)
    layer2 = from_slab(l2, H, W, jnp.float32)
    l3, H, W = run(body[7:21], l2, H, W)
    layer3 = from_slab(l3, H, W, jnp.float32)
    l4, H, W = run(body[21:], l3, H, W)
    layer4 = from_slab(l4, H, W, jnp.float32)

    output = output_head(params, l4)
    return [layer1, layer2, layer3, layer4, output]


# ----------------------------------------------------------------------------

if __name__ == "__main__":
    config = dict(num_layers=50, drop_ratio=0.6, mode="ir",
                  center_crop=None, model_path=None)   # synthetic init, no torch.load
    kg = KeyGen(42)
    params = build_params(kg)

    x = jax.random.normal(jax.random.PRNGKey(0), (2, 3, 64, 64), jnp.float32)
    outs = arcface_forward(params, x, config)
    outs = jax.block_until_ready(outs)

    layer1, layer2, layer3, layer4, emb = outs
    assert layer1.shape == (2, STAGE_WIDTHS[0], 56, 56)
    assert layer2.shape == (2, STAGE_WIDTHS[1], 28, 28)
    assert layer3.shape == (2, STAGE_WIDTHS[2], 14, 14)
    assert layer4.shape == (2, STAGE_WIDTHS[3], 7, 7)
    assert emb.shape == (2, EMB_DIM)
    norms = jnp.linalg.norm(emb, axis=1)
    assert bool(jnp.all(jnp.isfinite(emb)))
    assert bool(jnp.all(jnp.abs(norms - 1.0) < 1e-3))
    print("KERNEL_OK")
</pallas_src>

<mosaic_0001>
module attributes {stable_mosaic.version = 11 : i64} {
  func.func @_resize_kernel(%arg0: i32, %arg1: memref<1x64x64xf32, #tpu.memory_space<vmem>>, %arg2: memref<112x64xf32, #tpu.memory_space<vmem>>, %arg3: memref<64x112xf32, #tpu.memory_space<vmem>>, %arg4: memref<1x112x112xf32, #tpu.memory_space<vmem>>) attributes {dimension_semantics = [#tpu.dimension_semantics<parallel>], iteration_bounds = array<i64: 6>, scalar_prefetch = 0 : i64, scratch_operands = 0 : i64, tpu.core_type = #tpu.core_type<tc>, window_params = [{transform_indices = @transform_0, window_bounds = array<i64: 1, 64, 64>}, {pipeline_mode = #tpu.pipeline_mode<synchronous>, transform_indices = @transform_1, window_bounds = array<i64: 112, 64>}, {pipeline_mode = #tpu.pipeline_mode<synchronous>, transform_indices = @transform_2, window_bounds = array<i64: 64, 112>}, {transform_indices = @transform_3, window_bounds = array<i64: 1, 112, 112>}]} {
    %c0 = arith.constant 0 : index
    %c0_0 = arith.constant 0 : index
    %0 = vector.load %arg2[%c0, %c0_0] : memref<112x64xf32, #tpu.memory_space<vmem>>, vector<112x64xf32>
    %c0_1 = arith.constant 0 : index
    %c0_2 = arith.constant 0 : index
    %c0_3 = arith.constant 0 : index
    %1 = vector.load %arg1[%c0_1, %c0_2, %c0_3] : memref<1x64x64xf32, #tpu.memory_space<vmem>>, vector<1x64x64xf32>
    %2 = vector.shape_cast %1 : vector<1x64x64xf32> to vector<64x64xf32>
    %cst = arith.constant dense<0.000000e+00> : vector<112x64xf32>
    %3 = tpu.matmul %0, %2, %cst {dimension_numbers = #tpu.dot_dimension_numbers<[1], [0], [0], [1], [0, 0, 1, 1], [], []>} : vector<112x64xf32>, vector<64x64xf32>, vector<112x64xf32> -> vector<112x64xf32>
    %c0_4 = arith.constant 0 : index
    %c0_5 = arith.constant 0 : index
    %4 = vector.load %arg3[%c0_4, %c0_5] : memref<64x112xf32, #tpu.memory_space<vmem>>, vector<64x112xf32>
    %cst_6 = arith.constant dense<0.000000e+00> : vector<112x112xf32>
    %5 = tpu.matmul %3, %4, %cst_6 {dimension_numbers = #tpu.dot_dimension_numbers<[1], [0], [0], [1], [0, 0, 1, 1], [], []>} : vector<112x64xf32>, vector<64x112xf32>, vector<112x112xf32> -> vector<112x112xf32>
    %c0_7 = arith.constant 0 : index
    %c0_8 = arith.constant 0 : index
    %c0_9 = arith.constant 0 : index
    %6 = vector.load %arg4[%c0_7, %c0_8, %c0_9] : memref<1x112x112xf32, #tpu.memory_space<vmem>>, vector<1x112x112xf32>
    %7 = vector.shape_cast %6 : vector<1x112x112xf32> to vector<112x112xf32>
    %8 = vector.shape_cast %5 : vector<112x112xf32> to vector<1x112x112xf32>
    tpu.vector_store %arg4[%c0_7, %c0_8, %c0_9], %8 {strides = array<i32>} : memref<1x112x112xf32, #tpu.memory_space<vmem>>, vector<1x112x112xf32>,
    return
  }
  func.func @transform_0(%arg0: i32) -> (i32, i32, i32) {
    %c0_i32 = arith.constant 0 : i32
    %c0_i32_0 = arith.constant 0 : i32
    %c0_i32_1 = arith.constant 0 : i32
    return %arg0, %c0_i32, %c0_i32_0 : i32, i32, i32
  }
  func.func @transform_1(%arg0: i32) -> (i32, i32) {
    %c0_i32 = arith.constant 0 : i32
    %c0_i32_0 = arith.constant 0 : i32
    %c0_i32_1 = arith.constant 0 : i32
    return %c0_i32, %c0_i32_0 : i32, i32
  }
  func.func @transform_2(%arg0: i32) -> (i32, i32) {
    %c0_i32 = arith.constant 0 : i32
    %c0_i32_0 = arith.constant 0 : i32
    %c0_i32_1 = arith.constant 0 : i32
    return %c0_i32, %c0_i32_0 : i32, i32
  }
  func.func @transform_3(%arg0: i32) -> (i32, i32, i32) {
    %c0_i32 = arith.constant 0 : i32
    %c0_i32_0 = arith.constant 0 : i32
    %c0_i32_1 = arith.constant 0 : i32
    return %arg0, %c0_i32, %c0_i32_0 : i32, i32, i32
  }
}

</mosaic_0001>

<bundles_post_ra>
// kernel: tpu_custom_call.1
= control target key start
LH: loop header
LB: loop body
LE: loop exit
PB: predicated region body
PF: predicated region fallthrough
CT: control target
= control target key end

     0   :  { %8 = vsyncpa [#allocation3], 0  ;;  %s1328_s0 = inlined_call_operand.hbm [shape: f32[6,64,64], index: 0, kind: input, shape index: {}]   ;;  %s1329_s1 = inlined_call_operand.vmem [shape: f32[112,64], index: 1, kind: input, shape index: {}]   ;;  %s1330_s2 = inlined_call_operand.vmem [shape: f32[64,112], index: 2, kind: input, shape index: {}]   ;;  %s1331_s3 = inlined_call_operand.hbm [shape: f32[6,112,112], index: 3, kind: output, shape index: {}]  }
   0x1   :  { %10 = vsyncpa [#allocation3 + $0x1], 0 }
   0x2   :  { %11 = vsyncpa [#allocation4], 0 }
   0x3   :  { %13 = vsyncpa [#allocation4 + $0x1], 0  ;;  %s1042_s12 = smov 0   ;;  %s1044_s13 = smov 0  }
   0x4   :  { %s1046_s14 = smov 0   ;;  %s1048_s15 = smov 0  }
   0x5 LB: > { %s1063_s16 = sadd.s32 4294967295, %s1014_s15   ;;  %s676_s17 = sadd.s32 4294967294, %s1014_s15   ;;  %s1014_s15 = sphi %s1048_s15, %s1343_s15   ;;  %s1010_s14 = sphi %s1046_s14, %s1342_s14   ;;  %s1006_s13 = sphi %s1044_s13, %s1341_s13   ;;  %s1002_s12 = sphi %s1042_s12, %s1340_s12  }
   0x6   : > { %s1067_s18 = sadd.s32 1, %s1014_s15   ;;  %s26_s19 = sadd.s32 1, %s1010_s14 }
   0x7   : > { %s23_s20 = ssub.s32 %s1014_s15, %s1067_s18  ;;  %p33_p0 = scmp.ne.s32.totalorder %s1010_s14, %s1006_s13 }
   0x8   : > { %p24_p1 = scmp.eq.s32.totalorder %s23_s20, 0  ;;  %p34_p2 = scmp.eq.s32.totalorder %s1014_s15, 0 }
   0x9   : > { %p39_p3 = scmp.ne.s32.totalorder %s1006_s13, %s1002_s12  ;;  %p40_p4 = scmp.eq.s32.totalorder %s1063_s16, 0 }
   0xa   : > { %s1079_s21 = scalar_select %p24_p1, %s1010_s14, %s26_s19  }
   0xb   : > { %p1081_p5 = por %p34_p2, %p33_p0  ;;  %p1085_p6 = por %p40_p4, %p39_p3 }
   0xc   : > { %p105_p7 = scmp.eq.s32.totalorder %s1063_s16, 5  ;;  %p111_p8 = scmp.eq.s32.totalorder %s676_s17, 5 }
   0xd   : > { %p880_p9 = scmp.lt.s32.totalorder %s1014_s15, 6  ;;  %s137_s26 = sand.u32 1, %s1010_s14  }
   0xe   : > { %p1091_p10 = por %p105_p7, %p33_p0  ;;  %p1095_p11 = por %p111_p8, %p39_p3 }
   0xf   : > { %s715_s27 = sshll.u32 %s1014_s15, 10  ;;  %s679_s28 = sshll.u32 %s137_s26, 6 }
  0x10   : > { %s1335_s24 = scalar_select %p1091_p10, 1, 0 }
  0x11   : > { %s1336_s25 = scalar_select %p1095_p11, 1, 0 }
  0x12   : > { %s1104_s4 = scalar_lea.hbm %s1328_s0, %s715_s27  ;;  %s141_s5 = scalar_lea.vmem [#allocation2], %s679_s28 }
  0x13   : > { %s148_s6 = sshll.u32 %s141_s5, 4  ;;  %p1108_p12 = pnand %p880_p9, %p1081_p5  ;;  %s1112_s6 = int_to_ptr.vmem [resolvable:$true] %s148_s6 }
  0x14   : > { %s1114_s8 = scalar_lea.sflag [#allocation3], %s137_s26  ;;  %s918_s9 = scalar_lea.hbm %s1104_s4, 1024 }
  0x15   : > { %p919_p13 = scmp.ne.s32.totalorder %s1104_s4, %s918_s9  ;;  %p920_p0 = pneg %p1108_p12 }
  0x16   : > { %s923_s17 = scalar_lea.hbm %s1328_s0, 6144  ;;  %p924_p3 = scmp.lt.u32.totalorder %s1104_s4, %s1328_s0 }
  0x17   : > { %p921_p1 = pnand %p920_p0, %p919_p13  ;;  %p925_p4 = scmp.lt.u32.totalorder %s923_s17, %s918_s9 }
  0x18   : > { %p927_p7 = scmp.lt.u32.totalorder %s918_s9, %s1104_s4 }
  0x19   : > { %p922_p2 = pneg %p921_p1  ;;  %p926_p5 = por %p925_p4, %p924_p3 }
  0x1b   : > { %p928_p8 = por %p927_p7, %p926_p5 }
  0x1d   : > { %p929_p9 = pnand %p928_p8, %p922_p2 }
  0x1f   : > { %932 = shalt.err (!%p929_p9)
}
  0x20   : > { %s933_s22 = scalar_lea.vmem %s1112_s6, 1024  ;;  %s1016_s26 = smov [#allocation2]  }
  0x21   : > { %p934_p13 = scmp.ne.s32.totalorder %s1112_s6, %s933_s22  ;;  %s938_s27 = sshll.u32 %s1016_s26, 4  ;;  %s939_s27 = int_to_ptr.vmem [resolvable:$false] %s938_s27 }
  0x22   : > { %s940_s28 = scalar_lea.vmem %s939_s27, 2048  ;;  %p941_p10 = scmp.lt.s32.totalorder %s1112_s6, %s939_s27 }
  0x23   : > { %p936_p1 = pnand %p934_p13, %p920_p0  ;;  %p942_p3 = scmp.lt.s32.totalorder %s940_s28, %s933_s22 }
  0x25   : > { %p937_p11 = pneg %p936_p1  ;;  %p943_p4 = por %p942_p3, %p941_p10 }
  0x27   : > { %p944_p5 = pnand %p943_p4, %p937_p11 }
  0x29   : > { %947 = shalt.err (!%p944_p5)
}
  0x2a   : > { %s1017_s29 = smov 128   ;;  %s1018_s30 = smov 8  }
  0x2b   : > { %875 = dma.hbm_to_vmem [thread:$0]  (!%p1108_p12), %s1104_s4, 1024, %s1112_s6, %s1114_s8, %s1017_s29, %s1017_s29, %s1018_s30  }
  0x2c   : > { %p682_p0 = scmp.ge.s32.totalorder %s1014_s15, 1  ;;  %p156_p2 = scmp.lt.s32.totalorder %s1014_s15, 7 }
  0x2e   : > { %p157_p7 = pnand %p682_p0, %p156_p2 }
  0x2f   : > { %s1145_s5 = sand.u32 (!%p157_p7), 1, %s1006_s13  }
  0x30   : > { %160 = sbr.rel (%p157_p7) target bundleno = 541 (0x21d), region = 32  ;;  %s683_s9 = sshll.u32 (!%p157_p7), %s1145_s5, 6 }
  0x31   : > { %s163_s10 = scalar_lea.sflag (!%p157_p7), [#allocation3], %s1145_s5  ;;  %s166_s11 = scalar_lea.vmem (!%p157_p7), [#allocation2], %s683_s9 }
  0x37   : > { %993 = dma.done.wait (%p1085_p6), %s163_s10, 1024  }
  0x38   : > { %995 = vsyncadd (%p1085_p6), %s163_s10, 4294966272  ;;  %v203_v0 = vld [vmem:[%s166_s11] sm:$0xff]  ;;  %v204_v1 = vld [vmem:[%s166_s11 + $0x8] sm:$0xff]  ;;  %vm211_vm0 = vcmask 523264   ;;  %s866_s27 = smul.u32 112, %s1145_s5  ;;  %vm574_vm1 = vcmask 916480  }
  0x39   : > { %v205_v2 = vld [vmem:[%s166_s11 + $0x10] sm:$0xff]  ;;  %v834_v3 = vpack.c.bf16 %v204_v1, %v203_v0  ;;  %v206_v4 = vld [vmem:[%s166_s11 + $0x18] sm:$0xff]  ;;  %v207_v6 = vld [vmem:[%s166_s11 + $0x20] sm:$0xff]  ;;  %s867_s29 = smul.u32 1792, %s1063_s16  ;;  %s590_s16 = scalar_lea.sflag [#allocation4], %s1145_s5 }
  0x3a   : > { %v838_v5 = vpack.c.bf16 %v206_v4, %v205_v2  ;;  %v208_v7 = vld [vmem:[%s166_s11 + $0x28] sm:$0xff]  ;;  %v189_v8 = vld [vmem:[%s1329_s1] sm:$0xff]  ;;  %v209_v10 = vld [vmem:[%s166_s11 + $0x30] sm:$0xff]  ;;  %s1248_s28 = scalar_lea.vmem [#allocation5], %s866_s27  ;;  %p1338_p10 = scmp.ne.s32.totalorder %s1335_s24, 0 }
  0x3b   : > { %835 = vmatprep.subr.bf16.mxu0 %v834_v3  ;;  %776 = vmatprep.mubr.msk.f32.mxu0 %vm211_vm0, %v189_v8  ;;  %v842_v9 = vpack.c.bf16 %v208_v7, %v207_v6  ;;  %v210_v11 = vld [vmem:[%s166_s11 + $0x38] sm:$0xff]  ;;  %v389_v12 = vld [vmem:[%s1330_s2] sm:$0xff]  ;;  %v390_v13 = vld [vmem:[%s1330_s2 + $0x8] sm:$0xff]  ;;  %s603_s30 = sshll.u32 %s1248_s28, 4  ;;  %s1279_s11 = scalar_lea.hbm %s1331_s3, %s867_s29  ;;  %s1281_s30 = int_to_ptr.vmem [resolvable:$true] %s603_s30 }
  0x3c   : > { %837 = vmatpush3.bf16.msra.mxu0 %v834_v3  ;;  %v850_v14 = vpack.c.bf16 %v390_v13, %v389_v12  ;;  %v391_v15 = vld [vmem:[%s1330_s2 + $0x10] sm:$0xff]  ;;  %v392_v16 = vld [vmem:[%s1330_s2 + $0x18] sm:$0xff]  ;;  %v846_v17 = vpack.c.bf16 %v210_v11, %v209_v10  ;;  %v393_v19 = vld [vmem:[%s1330_s2 + $0x20] sm:$0xff]  ;;  %s948_s4 = scalar_lea.vmem %s1281_s30, 1792  ;;  %s1019_s6 = smov [#allocation5]  }
  0x3d   : > { %839 = vmatprep.subr.bf16.mxu0 %v838_v5  ;;  %v854_v18 = vpack.c.bf16 %v392_v16, %v391_v15  ;;  %v394_v20 = vld [vmem:[%s1330_s2 + $0x28] sm:$0xff]  ;;  %v395_v22 = vld [vmem:[%s1330_s2 + $0x30] sm:$0xff]  ;;  %v396_v23 = vld [vmem:[%s1330_s2 + $0x38] sm:$0xff]  ;;  %p949_p6 = scmp.ne.s32.totalorder %s1281_s30, %s948_s4  ;;  %s952_s23 = sshll.u32 %s1019_s6, 4  ;;  %s953_s23 = int_to_ptr.vmem [resolvable:$false] %s952_s23 }
  0x3e   : > { %851 = vmatprep.subr.bf16.mxu1 %v850_v14  ;;  %v858_v21 = vpack.c.bf16 %v394_v20, %v393_v19  ;;  %v190_v24 = vld [vmem:[%s1329_s1 + $0x8] sm:$0xff]  ;;  %v862_v25 = vpack.c.bf16 %v396_v23, %v395_v22  ;;  %v191_v26 = vld [vmem:[%s1329_s1 + $0x10] sm:$0xff]  ;;  %v192_v27 = vld [vmem:[%s1329_s1 + $0x18] sm:$0xff]  ;;  %s954_s7 = scalar_lea.vmem %s953_s23, 3584  ;;  %p955_p8 = scmp.lt.s32.totalorder %s1281_s30, %s953_s23 }
  0x3f   : > { %853 = vmatpush3.bf16.msra.mxu1 %v850_v14  ;;  %v193_v28 = vld [vmem:[%s1329_s1 + $0x20] sm:$0xff]  ;;  %v194_v29 = vld [vmem:[%s1329_s1 + $0x28] sm:$0xff]  ;;  %v195_v30 = vld [vmem:[%s1329_s1 + $0x30] sm:$0xff]  ;;  %p950_p11 = pnand %p949_p6, %p1338_p10  ;;  %p956_p9 = scmp.lt.s32.totalorder %s954_s7, %s948_s4 }
  0x40   : > { %841 = vmatpush3.bf16.msra.mxu0 %v838_v5  ;;  %855 = vmatprep.subr.bf16.mxu1 %v854_v18  ;;  %v196_v31 = vld [vmem:[%s1329_s1 + $0x38] sm:$0xff]  ;;  %v197_v32 = vld [vmem:[%s1329_s1 + $0x40] sm:$0xff]  ;;  %v198_v33 = vld [vmem:[%s1329_s1 + $0x48] sm:$0xff] }
  0x41   : > { %843 = vmatprep.subr.bf16.mxu0 %v842_v9  ;;  %v199_v34 = vld [vmem:[%s1329_s1 + $0x50] sm:$0xff]  ;;  %v200_v35 = vld [vmem:[%s1329_s1 + $0x58] sm:$0xff]  ;;  %v201_v36 = vld [vmem:[%s1329_s1 + $0x60] sm:$0xff]  ;;  %p951_p12 = pneg %p950_p11  ;;  %p957_p13 = por %p956_p9, %p955_p8 }
  0x42   : > { %v202_v37 = vld [vmem:[%s1329_s1 + $0x68] sm:$0xff] }
  0x43   : > { %857 = vmatpush3.bf16.msra.mxu1 %v854_v18  ;;  %p958_p1 = pnand %p957_p13, %p951_p12 }
  0x44   : > { %845 = vmatpush3.bf16.msra.mxu0 %v842_v9  ;;  %859 = vmatprep.subr.bf16.mxu1 %v858_v21 }
  0x45   : > { %847 = vmatprep.subr.bf16.mxu0 %v846_v17 }
  0x47   : > { %861 = vmatpush3.bf16.msra.mxu1 %v858_v21 }
  0x48   : > { %849 = vmatpush3.bf16.msra.mxu0 %v846_v17  ;;  %863 = vmatprep.subr.bf16.mxu1 %v862_v25 }
  0x4b   : > { %777 = vmatmul.mubr.msk.f32.vlgmr.msra.gmra.mrb[0].mxu0 %vm211_vm0, %v190_v24  ;;  %865 = vmatpush3.bf16.msra.mxu1 %v862_v25 }
  0x4c   : > { %779 = vmatprep.mubr.msk.f32.mxu0 %vm211_vm0, %v191_v26 }
  0x4f   : > { %780 = vmatmul.mubr.msk.f32.gmra.mrb[2].mxu0 %vm211_vm0, %v192_v27 }
  0x50   : > { %782 = vmatprep.mubr.msk.f32.mxu0 %vm211_vm0, %v193_v28 }
  0x53   : > { %783 = vmatmul.mubr.msk.f32.gmra.mrb[4].mxu0 %vm211_vm0, %v194_v29 }
  0x54   : > { %785 = vmatprep.mubr.msk.f32.mxu0 %vm211_vm0, %v195_v30 }
  0x57   : > { %786 = vmatmul.mubr.msk.f32.gmra.mrb[6].mxu0 %vm211_vm0, %v196_v31 }
  0x58   : > { %788 = vmatprep.mubr.msk.f32.mxu0 %vm211_vm0, %v197_v32 }
  0x5b   : > { %789 = vmatmul.mubr.msk.f32.gmra.mrb[8].mxu0 %vm211_vm0, %v198_v33 }
  0x5c   : > { %791 = vmatprep.mubr.msk.f32.mxu0 %vm211_vm0, %v199_v34 }
  0x5f   : > { %792 = vmatmul.mubr.msk.f32.gmra.mrb[10].mxu0 %vm211_vm0, %v200_v35 }
  0x60   : > { %794 = vmatprep.mubr.msk.f32.mxu0 %vm211_vm0, %v201_v36 }
  0x63   : > { %795 = vmatmul.mubr.msk.f32.gmra.mrb[12].mxu0 %vm211_vm0, %v202_v37 }
 0x11e   : > { %v778_v38 = vpop.f32.mrb[0].mxu0 }
 0x11f   : > { %v320_v39 = vpop.f32.mrb[1].mxu0 }
 0x120   : > { %813 = vmatprep.mubr.msk.f32.mxu1 %vm211_vm0, %v320_v39 }
 0x121   : > { %814 = vmatmul.mubr.msk.f32.vlgmr.msra.gmra.mrb[0].mxu1 %vm211_vm0, %v778_v38 }
 0x122   : > { %v781_v40 = vpop.f32.mrb[2].mxu0 }
 0x123   : > { %v330_v41 = vpop.f32.mrb[3].mxu0 }
 0x124   : > { %816 = vmatprep.mubr.msk.f32.mxu1 %vm211_vm0, %v330_v41 }
 0x125   : > { %817 = vmatmul.mubr.msk.f32.gmra.mrb[2].mxu1 %vm211_vm0, %v781_v40 }
 0x126   : > { %v784_v42 = vpop.f32.mrb[4].mxu0 }
 0x127   : > { %v340_v43 = vpop.f32.mrb[5].mxu0 }
 0x128   : > { %819 = vmatprep.mubr.msk.f32.mxu1 %vm211_vm0, %v340_v43 }
 0x129   : > { %820 = vmatmul.mubr.msk.f32.gmra.mrb[4].mxu1 %vm211_vm0, %v784_v42 }
 0x12a   : > { %v787_v44 = vpop.f32.mrb[6].mxu0 }
 0x12b   : > { %v350_v45 = vpop.f32.mrb[7].mxu0 }
 0x12c   : > { %822 = vmatprep.mubr.msk.f32.mxu1 %vm211_vm0, %v350_v45 }
 0x12d   : > { %823 = vmatmul.mubr.msk.f32.gmra.mrb[6].mxu1 %vm211_vm0, %v787_v44 }
 0x12e   : > { %v790_v46 = vpop.f32.mrb[8].mxu0 }
 0x12f   : > { %v360_v47 = vpop.f32.mrb[9].mxu0 }
 0x130   : > { %825 = vmatprep.mubr.msk.f32.mxu1 %vm211_vm0, %v360_v47 }
 0x131   : > { %826 = vmatmul.mubr.msk.f32.gmra.mrb[8].mxu1 %vm211_vm0, %v790_v46 }
 0x132   : > { %v793_v48 = vpop.f32.mrb[10].mxu0 }
 0x133   : > { %v370_v49 = vpop.f32.mrb[11].mxu0 }
 0x134   : > { %828 = vmatprep.mubr.msk.f32.mxu1 %vm211_vm0, %v370_v49 }
 0x135   : > { %829 = vmatmul.mubr.msk.f32.gmra.mrb[10].mxu1 %vm211_vm0, %v793_v48 }
 0x136   : > { %v796_v50 = vpop.f32.mrb[12].mxu0 }
 0x137   : > { %v380_v51 = vpop.f32.mrb[13].mxu0 }
 0x138   : > { %831 = vmatprep.mubr.msk.f32.mxu1 %vm211_vm0, %v380_v51 }
 0x139   : > { %832 = vmatmul.mubr.msk.f32.gmra.mrb[12].mxu1 %vm211_vm0, %v796_v50 }
 0x1f4   : > { %v815_v52 = vpop.f32.mrb[0].mxu1 }
 0x1f5   : > { %576 = vst.msk [vmem:[%s1248_s28 + $0x8] sm:$0xff] %vm574_vm1, %v815_v52  ;;  %v505_v53 = vpop.f32.mrb[1].mxu1 }
 0x1f6   : > { %575 = vst.msk [vmem:[%s1248_s28] sm:$0xff] %vm574_vm1, %v505_v53 }
 0x1f8   : > { %v818_v54 = vpop.f32.mrb[2].mxu1 }
 0x1f9   : > { %578 = vst.msk [vmem:[%s1248_s28 + $0x18] sm:$0xff] %vm574_vm1, %v818_v54  ;;  %v515_v55 = vpop.f32.mrb[3].mxu1 }
 0x1fa   : > { %577 = vst.msk [vmem:[%s1248_s28 + $0x10] sm:$0xff] %vm574_vm1, %v515_v55 }
 0x1fc   : > { %v821_v56 = vpop.f32.mrb[4].mxu1 }
 0x1fd   : > { %580 = vst.msk [vmem:[%s1248_s28 + $0x28] sm:$0xff] %vm574_vm1, %v821_v56  ;;  %v525_v57 = vpop.f32.mrb[5].mxu1 }
 0x1fe   : > { %579 = vst.msk [vmem:[%s1248_s28 + $0x20] sm:$0xff] %vm574_vm1, %v525_v57 }
 0x200   : > { %v824_v58 = vpop.f32.mrb[6].mxu1 }
 0x201   : > { %582 = vst.msk [vmem:[%s1248_s28 + $0x38] sm:$0xff] %vm574_vm1, %v824_v58  ;;  %v535_v59 = vpop.f32.mrb[7].mxu1 }
 0x202   : > { %581 = vst.msk [vmem:[%s1248_s28 + $0x30] sm:$0xff] %vm574_vm1, %v535_v59 }
 0x204   : > { %v827_v60 = vpop.f32.mrb[8].mxu1 }
 0x205   : > { %584 = vst.msk [vmem:[%s1248_s28 + $0x48] sm:$0xff] %vm574_vm1, %v827_v60  ;;  %v545_v61 = vpop.f32.mrb[9].mxu1 }
 0x206   : > { %583 = vst.msk [vmem:[%s1248_s28 + $0x40] sm:$0xff] %vm574_vm1, %v545_v61 }
 0x208   : > { %v830_v62 = vpop.f32.mrb[10].mxu1 }
 0x209   : > { %586 = vst.msk [vmem:[%s1248_s28 + $0x58] sm:$0xff] %vm574_vm1, %v830_v62  ;;  %v555_v63 = vpop.f32.mrb[11].mxu1 }
 0x20a   : > { %585 = vst.msk [vmem:[%s1248_s28 + $0x50] sm:$0xff] %vm574_vm1, %v555_v63 }
 0x20c   : > { %v833_v0 = vpop.f32.mrb[12].mxu1 }
 0x20d   : > { %588 = vst.msk [vmem:[%s1248_s28 + $0x68] sm:$0xff] %vm574_vm1, %v833_v0  ;;  %v565_v1 = vpop.f32.mrb[13].mxu1 }
 0x20e   : > { %587 = vst.msk [vmem:[%s1248_s28 + $0x60] sm:$0xff] %vm574_vm1, %v565_v1 }
 0x20f   : > { %961 = shalt.err (!%p958_p1)
}
 0x210   : > { %s962_s8 = scalar_lea.hbm %s1279_s11, 1792  ;;  %s966_s20 = scalar_lea.hbm %s1331_s3, 10752 }
 0x211   : > { %p963_p3 = scmp.ne.s32.totalorder %s1279_s11, %s962_s8  ;;  %p967_p0 = scmp.lt.u32.totalorder %s1279_s11, %s1331_s3 }
 0x212   : > { %p968_p2 = scmp.lt.u32.totalorder %s966_s20, %s962_s8  ;;  %p970_p6 = scmp.lt.u32.totalorder %s962_s8, %s1279_s11 }
 0x213   : > { %p964_p4 = pnand %p963_p3, %p1338_p10 }
 0x214   : > { %p969_p7 = por %p968_p2, %p967_p0 }
 0x215   : > { %p965_p5 = pneg %p964_p4 }
 0x216   : > { %p971_p11 = por %p970_p6, %p969_p7 }
 0x218   : > { %p972_p12 = pnand %p971_p11, %p965_p5 }
 0x21a   : > { %975 = shalt.err (!%p972_p12)
}
 0x21b   : > { %s1020_s27 = smov 128   ;;  %s1021_s28 = smov 8  }
 0x21c   : > { %870 = dma.vmem_to_hbm [thread:$0]  (%p1338_p10), %s1281_s30, 1792, %s1279_s11, %s590_s16, %s1020_s27, %s1020_s27, %s1021_s28  }
 0x21d PF: > { %p881_p8 = scmp.ge.s32.totalorder %s1014_s15, 2  ;;  %s618_s29 = sand.u32 1, %s1002_s12  }
 0x21e   : > { %p1339_p9 = scmp.ne.s32.totalorder %s1336_s25, 0  ;;  %s619_s9 = scalar_lea.sflag [#allocation4], %s618_s29 }
 0x220   : > { %p877_p13 = pnand %p881_p8, %p1339_p9 }
 0x222   : > { %997 = dma.done.wait (!%p877_p13), %s619_s9, 1792  }
 0x223   : > { %999 = vsyncadd (!%p877_p13), %s619_s9, 4294965504  ;;  %p16_p1 = scmp.ge.s32.totalorder %s1067_s18, 8   ;;  %s1340_s12 = smov %s1006_s13 }
 0x224   : > { %s1341_s13 = smov %s1010_s14  ;;  %s1342_s14 = smov %s1079_s21 }
 0x225   : > { %s1343_s15 = smov %s1067_s18  ;;  %18 = sbr.rel (!%p16_p1) target bundleno = 5 (0x5), region = 77 }
 0x22c   :  { %624 = vsyncpa [#allocation3], 1 }
 0x22d   :  { %626 = vsyncpa [#allocation3 + $0x1], 1 }
 0x22e   :  { %627 = vsyncpa [#allocation4], 1 }
 0x22f   :  { %629 = vsyncpa [#allocation4 + $0x1], 1 }

</bundles_post_ra>
